<compile_context>
chip_gen: v5e
topology: v5e:2x2
jax: 0.10.0
libtpu: 0.0.40
codegen_flags: <defaults>
</compile_context>

<pallas_src>
import jax
import jax.numpy as jnp
from jax.experimental import pallas as pl
from jax.experimental.pallas import tpu as pltpu


def flux_kernel(params_ref, e_ref, glogma_ref, out_ref):
    # params_ref lives in SMEM: [A, alpha, inv_beta, gamma]
    A        = params_ref[0]
    alpha    = params_ref[1]
    inv_beta = params_ref[2]
    gamma    = params_ref[3]

    E   = e_ref[...]        # (tm, tn) f32
    glm = glogma_ref[...]   # (tm, 1)  f32 = gamma * log(ma), broadcasts vs E

    log_E = jnp.log(E)
    # S = clamp(1 - (ma/E)**gamma, 0) = clamp(1 - exp(gamma*log ma - gamma*log E), 0)
    s = jnp.maximum(1.0 - jnp.exp(glm - gamma * log_E), 0.0)
    # A * E**alpha * exp(-E/beta) = A * exp(alpha*log E - E/beta)
    out_ref[...] = A * jnp.exp(alpha * log_E - E * inv_beta) * s


def _choose_tiles(M, N, max_tile_bytes=4 << 20):
    """Pick (tm, tn): lane-dense, (8,128)-legal, ~max_tile_bytes per buffer,
    preferring full-row tiles and >= 2 grid steps along rows."""
    # Column tile: full rows if even 8 rows of full width fit the budget,
    # else the largest multiple of 128 dividing N that fits.
    if 8 * N * 4 <= max_tile_bytes:
        tn = N
    else:
        tn = None
        c = ((max_tile_bytes // (8 * 4)) // 128) * 128
        while c >= 128:
            if N % c == 0:
                tn = c
                break
            c -= 128
        if tn is None:
            tn = N  # non-128-multiple N: full-width block is always legal
    # Row tile: largest multiple of 8 dividing M within budget; keep >= 2
    # grid steps along rows when possible (v7x megacore sharding).
    if M % 8 != 0:
        return M, tn
    max_rows = max(8, ((max_tile_bytes // (tn * 4)) // 8) * 8)
    cand = [r for r in range(8, M + 1, 8) if M % r == 0 and r <= max_rows]
    if not cand:
        return M, tn
    tm = max(cand)
    if M // tm == 1:
        smaller = [r for r in cand if M // r >= 2]
        if smaller:
            tm = max(smaller)
    return tm, tn


def flux_pallas(params, photon_energy, axion_mass, *, max_tile_bytes=4 << 20):
    """params: (4,) float32 = [A, alpha, beta, gamma].

    photon_energy: (M, N) float32, strictly positive (physical domain).
    axion_mass:    broadcastable to (M, 1), non-negative.
    """
    E = jnp.asarray(photon_energy, jnp.float32)
    M, N = E.shape
    ma = jnp.broadcast_to(jnp.asarray(axion_mass, jnp.float32), (M, 1))

    p = jnp.asarray(params, jnp.float32)
    A, alpha, beta, gamma = p[0], p[1], p[2], p[3]
    kparams = jnp.stack([A, alpha, 1.0 / beta, gamma])   # precompute 1/beta
    # Hoist the column transcendental + gamma multiply out of the kernel.
    glogma = gamma * jnp.log(ma)                           # (M, 1)

    tm, tn = _choose_tiles(M, N, max_tile_bytes)
    assert M % tm == 0 and N % tn == 0
    grid = (M // tm, N // tn)

    return pl.pallas_call(
        flux_kernel,
        out_shape=jax.ShapeDtypeStruct((M, N), jnp.float32),
        grid_spec=pltpu.PrefetchScalarGridSpec(
            num_scalar_prefetch=0,
            grid=grid,
            in_specs=[
                pl.BlockSpec(memory_space=pltpu.MemorySpace.SMEM),    # params
                pl.BlockSpec((tm, tn), lambda i, j: (i, j)),          # E tile
                pl.BlockSpec((tm, 1),  lambda i, j: (i, 0)),          # gamma*log(ma) column
            ],
            out_specs=pl.BlockSpec((tm, tn), lambda i, j: (i, j)),
        ),
        compiler_params=pltpu.CompilerParams(
            dimension_semantics=("parallel", "parallel"),
            vmem_limit_bytes=32 << 20),   # ~16 MiB double-buffered in+out + slack
    )(kparams, E, glogma)


def flux_reference(params, photon_energy, axion_mass):
    # Naive pow/div form, matching the PyTorch module literally.
    A, alpha, beta, gamma = params
    E = jnp.asarray(photon_energy, jnp.float32)
    ma = jnp.broadcast_to(jnp.asarray(axion_mass, jnp.float32), E.shape)
    s = jnp.clip(1.0 - (ma / E) ** gamma, 0.0)
    return A * (E ** alpha) * jnp.exp(-E / beta) * s


if __name__ == "__main__":
    # Deterministic parameters, matching the nn.Module defaults.
    params = jnp.array([6.02, 2.481, 1.205, 1.7], dtype=jnp.float32)

    key = jax.random.PRNGKey(0)
    k_e, k_m = jax.random.split(key)

    # Small, tile-friendly shapes: positive photon energies, per-row axion
    # mass column (broadcast handled inside the kernel).
    E = jax.random.uniform(k_e, (16, 256), dtype=jnp.float32,
                           minval=0.5, maxval=10.0)
    ma = jax.random.uniform(k_m, (16, 1), dtype=jnp.float32,
                            minval=0.1, maxval=2.0)

    out = flux_pallas(params, E, ma)
    out = jax.block_until_ready(out)

    ref = flux_reference(params, E, ma)
    assert out.shape == E.shape and out.dtype == jnp.float32
    # Fused exp/log form differs from the naive pow lowering only at the
    # ~1e-6 relative level.
    assert jnp.allclose(out, ref, rtol=1e-4, atol=1e-6), "mismatch vs reference"

    print("KERNEL_OK")
</pallas_src>

<mosaic_0001>
module attributes {stable_mosaic.version = 11 : i64} {
  func.func @flux_kernel(%arg0: i32, %arg1: i32, %arg2: memref<4xf32, #tpu.memory_space<smem>>, %arg3: memref<8x256xf32, #tpu.memory_space<vmem>>, %arg4: memref<8x1xf32, #tpu.memory_space<vmem>>, %arg5: memref<8x256xf32, #tpu.memory_space<vmem>>) attributes {dimension_semantics = [#tpu.dimension_semantics<parallel>, #tpu.dimension_semantics<parallel>], iteration_bounds = array<i64: 2, 1>, scalar_prefetch = 0 : i64, scratch_operands = 0 : i64, tpu.core_type = #tpu.core_type<tc>, window_params = [{transform_indices = @transform_0, window_bounds = array<i64: 4>}, {transform_indices = @transform_1, window_bounds = array<i64: 8, 256>}, {transform_indices = @transform_2, window_bounds = array<i64: 8, 1>}, {transform_indices = @transform_3, window_bounds = array<i64: 8, 256>}]} {
    %c0 = arith.constant 0 : index
    %0 = memref.load %arg2[%c0] : memref<4xf32, #tpu.memory_space<smem>>
    %c1 = arith.constant 1 : index
    %1 = memref.load %arg2[%c1] : memref<4xf32, #tpu.memory_space<smem>>
    %c2 = arith.constant 2 : index
    %2 = memref.load %arg2[%c2] : memref<4xf32, #tpu.memory_space<smem>>
    %c3 = arith.constant 3 : index
    %3 = memref.load %arg2[%c3] : memref<4xf32, #tpu.memory_space<smem>>
    %c0_0 = arith.constant 0 : index
    %c0_1 = arith.constant 0 : index
    %4 = vector.load %arg3[%c0_0, %c0_1] : memref<8x256xf32, #tpu.memory_space<vmem>>, vector<8x256xf32>
    %c0_2 = arith.constant 0 : index
    %c0_3 = arith.constant 0 : index
    %5 = vector.load %arg4[%c0_2, %c0_3] : memref<8x1xf32, #tpu.memory_space<vmem>>, vector<8x1xf32>
    %6 = math.log %4 : vector<8x256xf32>
    %7 = vector.broadcast %3 : f32 to vector<8x256xf32>
    %8 = arith.mulf %7, %6 : vector<8x256xf32>
    %9 = vector.broadcast %5 : vector<8x1xf32> to vector<8x256xf32>
    %10 = arith.subf %9, %8 : vector<8x256xf32>
    %11 = math.exp %10 : vector<8x256xf32>
    %cst = arith.constant 1.000000e+00 : f32
    %12 = vector.broadcast %cst : f32 to vector<8x256xf32>
    %13 = arith.subf %12, %11 : vector<8x256xf32>
    %cst_4 = arith.constant 0.000000e+00 : f32
    %14 = vector.broadcast %cst_4 : f32 to vector<8x256xf32>
    %15 = arith.maximumf %13, %14 : vector<8x256xf32>
    %16 = vector.broadcast %1 : f32 to vector<8x256xf32>
    %17 = arith.mulf %16, %6 : vector<8x256xf32>
    %18 = vector.broadcast %2 : f32 to vector<8x256xf32>
    %19 = arith.mulf %4, %18 : vector<8x256xf32>
    %20 = arith.subf %17, %19 : vector<8x256xf32>
    %21 = math.exp %20 : vector<8x256xf32>
    %22 = vector.broadcast %0 : f32 to vector<8x256xf32>
    %23 = arith.mulf %22, %21 : vector<8x256xf32>
    %24 = arith.mulf %23, %15 : vector<8x256xf32>
    %c0_5 = arith.constant 0 : index
    %c0_6 = arith.constant 0 : index
    %25 = vector.load %arg5[%c0_5, %c0_6] : memref<8x256xf32, #tpu.memory_space<vmem>>, vector<8x256xf32>
    tpu.vector_store %arg5[%c0_5, %c0_6], %24 {strides = array<i32>} : memref<8x256xf32, #tpu.memory_space<vmem>>, vector<8x256xf32>,
    return
  }
  func.func @transform_0(%arg0: i32, %arg1: i32) -> i32 {
    %c0_i32 = arith.constant 0 : i32
    %c0_i32_0 = arith.constant 0 : i32
    return %c0_i32 : i32
  }
  func.func @transform_1(%arg0: i32, %arg1: i32) -> (i32, i32) {
    %c0_i32 = arith.constant 0 : i32
    return %arg0, %arg1 : i32, i32
  }
  func.func @transform_2(%arg0: i32, %arg1: i32) -> (i32, i32) {
    %c0_i32 = arith.constant 0 : i32
    %c0_i32_0 = arith.constant 0 : i32
    return %arg0, %c0_i32 : i32, i32
  }
  func.func @transform_3(%arg0: i32, %arg1: i32) -> (i32, i32) {
    %c0_i32 = arith.constant 0 : i32
    return %arg0, %arg1 : i32, i32
  }
}

</mosaic_0001>

<bundles_post_ra>
// kernel: tpu_custom_call.1
= control target key start
LH: loop header
LB: loop body
LE: loop exit
PB: predicated region body
PF: predicated region fallthrough
CT: control target
= control target key end

     0   :  { %8 = vsyncpa [#allocation5], 0  ;;  %s834_s0 = inlined_call_operand.vmem [shape: f32[4], index: 0, kind: input, shape index: {}]   ;;  %s835_s1 = inlined_call_operand.hbm [shape: f32[16,256], index: 1, kind: input, shape index: {}]   ;;  %s836_s2 = inlined_call_operand.vmem [shape: f32[16,1], index: 2, kind: input, shape index: {}]   ;;  %s837_s3 = inlined_call_operand.hbm [shape: f32[16,256], index: 3, kind: output, shape index: {}]  }
   0x1   :  { %9 = vsyncpa [#allocation3], 0 }
   0x2   :  { %11 = vsyncpa [#allocation3 + $0x1], 0 }
   0x3   :  { %12 = vsyncpa [#allocation4], 0 }
   0x4   :  { %14 = vsyncpa [#allocation4 + $0x1], 0  ;;  %s680_s12 = smov 0   ;;  %s682_s13 = smov 0  }
   0x5   :  { %s684_s14 = smov 0   ;;  %s686_s15 = smov 0  }
   0x6   :  { %s688_s16 = smov 0   ;;  %s690_s17 = smov 0  }
   0x7 LB: > { %s415_s18 = sadd.s32 4294967295, %s656_s17   ;;  %s416_s19 = sadd.s32 4294967294, %s656_s17   ;;  %s656_s17 = sphi %s690_s17, %s20_s17   ;;  %s652_s16 = sphi %s688_s16, %s849_s16   ;;  %s648_s15 = sphi %s686_s15, %s848_s15   ;;  %s644_s14 = sphi %s684_s14, %s847_s14   ;;  %s640_s13 = sphi %s682_s13, %s846_s13   ;;  %s636_s12 = sphi %s680_s12, %s845_s12  }
   0x8   : > { %p75_p0 = scmp.ne.s32.totalorder %s640_s13, %s636_s12  ;;  %p714_p1 = scmp.eq.s32.totalorder %s415_s18, 0 }
   0x9   : > { %p718_p2 = scmp.eq.s32.totalorder %s415_s18, 1  ;;  %p133_p3 = scmp.eq.s32.totalorder %s416_s19, 1 }
   0xa   : > { %p724_p4 = por %p714_p1, %p75_p0  ;;  %p417_p5 = scmp.ge.s32.totalorder %s656_s17, 1 }
   0xb   : > { %p729_p6 = por %p133_p3, %p75_p0  ;;  %p140_p7 = scmp.lt.s32.totalorder %s656_s17, 3 }
   0xc   : > { %s152_s26 = sshll.u32 %s834_s0, 4  ;;  %s32_s28 = sadd.s32 1, %s652_s16  ;;  %s153_s26 = int_to_ptr.vmem [resolvable:$true] %s152_s26 }
   0xd   : > { %p737_p8 = pnand %p417_p5, %p140_p7  ;;  %s62_s29 = sadd.s32 1, %s644_s14 }
   0xe   : > { %p34_p12 = scmp.ge.s32.totalorder %s32_s28, 2  ;;  %s658_s30 = smov [#allocation2]  }
   0xf   : > { %p446_p10 = pneg %p737_p8  ;;  %p69_p13 = scmp.ne.s32.totalorder %s644_s14, %s640_s13 }
  0x10   : > { %s851_s28 = smov (%p34_p12, %s32_s28), 0  ;;  %p70_p0 = scmp.eq.s32.totalorder %s656_s17, 0 }
  0x11   : > { %p447_p11 = pnand %p446_p10, %p714_p1  ;;  %s57_s4 = ssub.s32 %s652_s16, %s851_s28 }
  0x12   : > { %p459_p3 = scmp.lt.s32.totalorder %s656_s17, 2  ;;  %p60_p5 = scmp.eq.s32.totalorder %s57_s4, 0 }
  0x13   : > { %449 = dma.vmem_to_smem (!%p447_p11), %s153_s26, 16, %s658_s30, [#allocation5]  }
  0x14   : > { %p71_p7 = por %p70_p0, %p69_p13  ;;  %p758_p9 = por %p718_p2, %p69_p13 }
  0x15   : > { %s163_s6 = sand.u32 1, %s644_s14   ;;  %s436_s9 = sshll.u32 %s652_s16, 4 }
  0x16   : > { %s764_s7 = scalar_select %p60_p5, %s644_s14, %s62_s29  }
  0x17   : > { %s420_s8 = sshll.u32 %s163_s6, 4  ;;  %s174_s18 = scalar_lea.hbm %s835_s1, %s436_s9 }
  0x18   : > { %s167_s19 = scalar_lea.vmem [#allocation6], %s420_s8  ;;  %s176_s25 = sshll.u32 %s174_s18, 4  ;;  %s177_s25 = int_to_ptr.hbm [resolvable:$true] %s176_s25 }
  0x19   : > { %s178_s24 = sshll.u32 %s167_s19, 4  ;;  %p451_p10 = pnand %p459_p3, %p71_p7  ;;  %s179_s24 = int_to_ptr.vmem [resolvable:$true] %s178_s24 }
  0x1a   : > { %s164_s21 = scalar_lea.sflag [#allocation3], %s163_s6  ;;  %194 = sbr.rel (%p737_p8) target bundleno = 181 (0xb5), region = 32 }
  0x1b   : > { %453 = dma.hbm_to_vmem [thread:$0]  (!%p451_p10), %s177_s25, 256, %s179_s24, %s164_s21  }
  0x1f   : > { %623 = dma.done.wait (%p714_p1), [#allocation5], 16  }
  0x20   : > { %625 = vsyncadd (%p714_p1), [#allocation5], 4294967280  ;;  %s779_s26 = sand.u32 1, %s640_s13  }
  0x21   : > { %s425_s29 = sshll.u32 %s779_s26, 4  ;;  %s202_s30 = scalar_lea.sflag [#allocation3], %s779_s26 }
  0x22   : > { %s205_s4 = scalar_lea.vmem [#allocation6], %s425_s29 }
  0x23   : > { %627 = dma.done.wait (%p724_p4), %s202_s30, 256  }
  0x24   : > { %629 = vsyncadd (%p724_p4), %s202_s30, 4294967040 }
  0x25   : > { %211 = sfence }
  0x26   : > { %p235_p1 = scmp.lt.s32.totalorder %s648_s15, 1  ;;  %v659_v0 = vmov 0   ;;  %v244_v2 = vld [vmem:[%s205_s4] sm:$0xff]  ;;  %v245_v3 = vld [vmem:[%s205_s4 + $0x8] sm:$0xff]  ;;  %s428_s10 = sld [smem:[#allocation2 + $0x1]] }
  0x27   : > { %512 = vset.pattern.permute.xlu0 %v659_v0  ;;  %s429_s11 = sld [smem:[#allocation2 + $0x2]]  ;;  %513 = vlog2.f32 %v244_v2  ;;  %s437_s19 = sshll.u32 %s648_s15, 4 }
  0x28   : > { %s236_s20 = scalar_select %p235_p1, %s648_s15, 1  ;;  %515 = vlog2.f32 %v245_v3 }
  0x29   : > { %s430_s22 = sld [smem:[#allocation2 + $0x3]]  ;;  %s302_s21 = scalar_lea.hbm %s837_s3, %s437_s19 }
  0x2a   : > { %s427_s27 = sshll.u32 %s236_s20, 3  ;;  %s240_s18 = sld [smem:[#allocation2]] }
  0x2b   : > { %s238_s9 = scalar_lea.vmem %s836_s2, %s427_s27  ;;  %s233_s30 = scalar_lea.vmem [#allocation7], %s425_s29 }
  0x2c   : > { %v246_v1 = vld [vmem:[%s238_s9] sm:$0xff]  ;;  %v269_v6 = vstv %s428_s10  ;;  %s304_s4 = sshll.u32 %s233_s30, 4  ;;  %s306_s15 = sshll.u32 %s302_s21, 4  ;;  %s305_s4 = int_to_ptr.vmem [resolvable:$true] %s304_s4  ;;  %s307_s15 = int_to_ptr.hbm [resolvable:$true] %s306_s15 }
  0x2d   : > { %256 = vperm.xlu0 %512, %v246_v1   ;;  %v514_v4 = vpop.eup %513  ;;  %v272_v7 = vstv %s429_s11  ;;  %s289_s20 = scalar_lea.sflag [#allocation4], %s779_s26  ;;  %s584_s27 = sshra.s32 %s307_s15, 4  ;;  %s585_s27 = int_to_ptr.hbm [resolvable:$true] %s584_s27 }
  0x2e   : > { %v516_v5 = vpop.eup %515  ;;  %v248_v8 = vmul.f32 0.6931472, %v514_v4  ;;  %v273_v11 = vmul.f32 %v272_v7, %v244_v2  ;;  %v274_v13 = vmul.f32 %v272_v7, %v245_v3  ;;  %s586_s6 = scalar_lea.hbm %s585_s27, 16  ;;  %s590_s29 = scalar_lea.hbm %s837_s3, 32 }
  0x2f   : > { %v250_v9 = vmul.f32 0.6931472, %v516_v5  ;;  %v251_v14 = vstv %s430_s22  ;;  %p587_p2 = scmp.ne.s32.totalorder %s585_s27, %s586_s6  ;;  %p591_p11 = scmp.lt.s32.totalorder %s585_s27, %s837_s3 }
  0x30   : > { %v270_v10 = vmul.f32 %v269_v6, %v248_v8  ;;  %v252_v17 = vmul.f32 %v251_v14, %v248_v8  ;;  %v281_v27 = vstv %s240_s18  ;;  %p592_p12 = scmp.lt.s32.totalorder %s590_s29, %s586_s6 }
  0x31   : > { %v271_v12 = vmul.f32 %v269_v6, %v250_v9  ;;  %v253_v18 = vmul.f32 %v251_v14, %v250_v9  ;;  %p588_p4 = pnand %p587_p2, %p758_p9 }
  0x32   : > { %v275_v15 = vsub.f32 %v270_v10, %v273_v11  ;;  %p593_p13 = por %p592_p12, %p591_p11 }
  0x33   : > { %v276_v16 = vsub.f32 %v271_v12, %v274_v13  ;;  %p589_p8 = pneg %p588_p4 }
  0x34   : > { %v277_v19 = vmul.f32 1.442695, %v275_v15 }
  0x35   : > { %v279_v20 = vmul.f32 1.442695, %v276_v16  ;;  %p594_p0 = pnand %p593_p13, %p589_p8 }
  0x36   : > { %517 = vpow2.f32 %v277_v19 }
  0x37   : > { %519 = vpow2.f32 %v279_v20 }
  0x3c   : > { %v518_v26 = vpop.eup %517 }
  0x3d   : > { %v520_v28 = vpop.eup %519  ;;  %v282_v31 = vmul.f32 %v518_v26, %v281_v27 }
  0x3e   : > { %v283_v33 = vmul.f32 %v520_v28, %v281_v27 }
  0x9f   : > { %v257_v21 = vpop.permute.xlu0 %256 }
  0xa0   : > { %v259_v22 = vsub.f32 %v257_v21, %v252_v17  ;;  %v260_v23 = vsub.f32 %v257_v21, %v253_v18 }
  0xa2   : > { %v261_v24 = vmul.f32 1.442695, %v259_v22  ;;  %v263_v25 = vmul.f32 1.442695, %v260_v23 }
  0xa4   : > { %521 = vpow2.f32 %v261_v24 }
  0xa5   : > { %523 = vpow2.f32 %v263_v25 }
  0xaa   : > { %v522_v29 = vpop.eup %521 }
  0xab   : > { %v524_v30 = vpop.eup %523  ;;  %v265_v32 = vsub.f32 1.0, %v522_v29 }
  0xac   : > { %v266_v34 = vsub.f32 1.0, %v524_v30 }
  0xad   : > { %v267_v35 = vmax.f32 %v265_v32, 0.0 }
  0xae   : > { %v268_v36 = vmax.f32 %v266_v34, 0.0 }
  0xaf   : > { %v284_v37 = vmul.f32 %v282_v31, %v267_v35 }
  0xb0   : > { %v285_v38 = vmul.f32 %v283_v33, %v268_v36 }
  0xb1   : > { %286 = vst [vmem:[%s233_s30] sm:$0xff] %v284_v37 }
  0xb2   : > { %287 = vst [vmem:[%s233_s30 + $0x8] sm:$0xff] %v285_v38 }
  0xb3   : > { %597 = shalt.err (!%p594_p0)
}
  0xb4   : > { %444 = dma.vmem_to_hbm [thread:$0]  (%p758_p9), %s305_s4, 256, %s307_s15, %s289_s20  }
  0xb5 PF: > { %s318_s26 = sand.u32 1, %s636_s12   ;;  %p844_p3 = scmp.ge.s32.totalorder %s656_s17, 2 }
  0xb6   : > { %s319_s22 = scalar_lea.sflag [#allocation4], %s318_s26 }
  0xb7   : > { %p455_p5 = pnand %p844_p3, %p729_p6 }
  0xb9   : > { %p456_p7 = pneg %p455_p5 }
  0xbb   : > { %631 = dma.done.wait (%p456_p7), %s319_s22, 256  }
  0xbc   : > { %633 = vsyncadd (%p456_p7), %s319_s22, 4294967040  ;;  %s20_s17 = sadd.s32 1, %s656_s17   ;;  %s845_s12 = smov %s640_s13 }
  0xbd   : > { %p17_p10 = scmp.ge.s32.totalorder %s20_s17, 4   ;;  %s846_s13 = smov %s644_s14 }
  0xbe   : > { %s847_s14 = smov %s764_s7  ;;  %s848_s15 = smov %s652_s16 }
  0xbf   : > { %s849_s16 = smov %s851_s28  ;;  %19 = sbr.rel (!%p17_p10) target bundleno = 7 (0x7), region = 85 }
  0xc4   :  { %325 = vsyncpa [#allocation3], 1 }
  0xc5   :  { %327 = vsyncpa [#allocation3 + $0x1], 1 }
  0xc6   :  { %328 = vsyncpa [#allocation4], 1 }
  0xc7   :  { %330 = vsyncpa [#allocation4 + $0x1], 1 }
  0xc8   :  { %331 = vsyncpa [#allocation5], 1 }
  0xc9   :  { %333 = vsyncpa [#allocation5 + $0x1], 1 }

</bundles_post_ra>
